<compile_context>
chip_gen: v6e
topology: v6e:2x2x1
jax: 0.10.0
libtpu: 0.0.40
codegen_flags: <defaults>
</compile_context>

<pallas_src>
import jax
import jax.numpy as jnp
from jax import lax
from jax.experimental import pallas as pl
from jax.experimental.pallas import tpu as pltpu


# ------------------------------------------------------------------ #
# helpers
# ------------------------------------------------------------------ #
def _round_up(x, m):
    return ((x + m - 1) // m) * m


def _pad_rows(a, target_rows):
    r = a.shape[0]
    if r == target_rows:
        return a
    pad = [(0, target_rows - r)] + [(0, 0)] * (a.ndim - 1)
    return jnp.pad(a, pad)


# ------------------------------------------------------------------ #
# Kernel 1: per-example prediction + squared error (training hot path)
# ------------------------------------------------------------------ #
def _pair_se_kernel(ue_ref, ie_ref, r_ref, se_ref):
    # preds[b] = sum_k Ue[b,k] * Ie[b,k]   (VPU mul + XLU lane reduce)
    prod = ue_ref[...].astype(jnp.float32) * ie_ref[...].astype(jnp.float32)
    preds = jnp.sum(prod, axis=-1, keepdims=True)            # [tb, 1]
    diff = preds - r_ref[...].astype(jnp.float32)
    se_ref[...] = (diff * diff).astype(se_ref.dtype)          # SE(preds, rating)


def mf_forward_se(user_emb, item_emb, user_idx, item_idx, rating, tb=512):
    """Equivalent of `SE(self(user, item), rating)` in _MF.fit()."""
    # TODO(synk): the embedding row-gather stays in XLA; each row is only
    # K*4 bytes so an in-kernel per-row DMA gather would be descriptor-bound.
    B = user_idx.shape[0]
    Kd = user_emb.shape[1]
    tb = min(tb, _round_up(B, 8))
    B_pad = _round_up(B, tb)

    uix = jnp.pad(user_idx, (0, B_pad - B))
    iix = jnp.pad(item_idx, (0, B_pad - B))
    ue = user_emb[uix]                                        # [B_pad, K]
    ie = item_emb[iix]                                        # [B_pad, K]
    r2d = jnp.pad(rating.astype(jnp.float32), (0, B_pad - B)).reshape(B_pad, 1)

    se = pl.pallas_call(
        _pair_se_kernel,
        out_shape=jax.ShapeDtypeStruct((B_pad, 1), jnp.float32),
        grid=(B_pad // tb,),
        in_specs=[
            pl.BlockSpec((tb, Kd), lambda i: (i, 0)),
            pl.BlockSpec((tb, Kd), lambda i: (i, 0)),
            pl.BlockSpec((tb, 1), lambda i: (i, 0)),
        ],
        out_specs=pl.BlockSpec((tb, 1), lambda i: (i, 0)),
        compiler_params=pltpu.CompilerParams(
            dimension_semantics=("parallel",)),
    )(ue, ie, r2d)
    return se[:B, 0]


# ------------------------------------------------------------------ #
# Kernel 2: pred_all  ->  U @ V^T  (full rating matrix, MXU matmul)
# ------------------------------------------------------------------ #
def _pred_all_kernel(u_ref, v_ref, o_ref):
    # Contract K on both operands directly (no in-kernel transpose of V).
    o_ref[...] = lax.dot_general(
        u_ref[...], v_ref[...],
        dimension_numbers=(((1,), (1,)), ((), ())),
        preferred_element_type=jnp.float32,
    ).astype(o_ref.dtype)


def _mf_tiles(n_user, n_item, tm, tn):
    tm = min(tm, _round_up(n_user, 8))
    tn = min(tn, _round_up(n_item, 128))
    M = _round_up(n_user, tm)
    N = _round_up(n_item, tn)
    return tm, tn, M, N


def mf_pred_all(user_emb, item_emb, tm=256, tn=256):
    n_user, Kd = user_emb.shape
    n_item, _ = item_emb.shape
    tm, tn, M, N = _mf_tiles(n_user, n_item, tm, tn)
    U = _pad_rows(user_emb.astype(jnp.float32), M)
    V = _pad_rows(item_emb.astype(jnp.float32), N)

    cost = pl.CostEstimate(
        flops=2 * M * N * Kd,
        transcendentals=0,
        bytes_accessed=4 * (M * Kd + N * Kd + M * N),
    )
    out = pl.pallas_call(
        _pred_all_kernel,
        out_shape=jax.ShapeDtypeStruct((M, N), jnp.float32),
        grid=(M // tm, N // tn),
        in_specs=[
            pl.BlockSpec((tm, Kd), lambda i, j: (i, 0)),
            pl.BlockSpec((tn, Kd), lambda i, j: (j, 0)),
        ],
        out_specs=pl.BlockSpec((tm, tn), lambda i, j: (i, j)),
        compiler_params=pltpu.CompilerParams(
            dimension_semantics=("parallel", "parallel"),
            vmem_limit_bytes=32 * 1024 * 1024,
        ),
        cost_estimate=cost,
    )(U, V)
    return out[:n_user, :n_item]


# ------------------------------------------------------------------ #
# Kernel 3: fused pred_all + maskedSE (test metric) — never writes the
# dense prediction matrix to HBM.
# ------------------------------------------------------------------ #
# TODO(synk): PyTorch's maskedSE returns a dynamically-shaped vector of only
# the masked elements; here we return the dense matrix with zeros at masked
# positions (same nonzero values / same sum).
def _masked_se_fused_kernel(u_ref, v_ref, t_ref, o_ref):
    pred = lax.dot_general(
        u_ref[...], v_ref[...],
        dimension_numbers=(((1,), (1,)), ((), ())),
        preferred_element_type=jnp.float32,
    )
    tgt = t_ref[...].astype(jnp.float32)
    diff = pred - tgt
    o_ref[...] = jnp.where(tgt != 0.0, diff * diff, 0.0).astype(o_ref.dtype)


def mf_masked_se(user_emb, item_emb, target, tm=256, tn=256):
    """maskedSE(pred_all(), target), fused into a single tiled kernel."""
    n_user, Kd = user_emb.shape
    n_item, _ = item_emb.shape
    tm, tn, M, N = _mf_tiles(n_user, n_item, tm, tn)
    U = _pad_rows(user_emb.astype(jnp.float32), M)
    V = _pad_rows(item_emb.astype(jnp.float32), N)
    T = jnp.pad(target.astype(jnp.float32),
                ((0, M - n_user), (0, N - n_item)))

    cost = pl.CostEstimate(
        flops=2 * M * N * Kd + 3 * M * N,
        transcendentals=0,
        bytes_accessed=4 * (M * Kd + N * Kd + 2 * M * N),
    )
    out = pl.pallas_call(
        _masked_se_fused_kernel,
        out_shape=jax.ShapeDtypeStruct((M, N), jnp.float32),
        grid=(M // tm, N // tn),
        in_specs=[
            pl.BlockSpec((tm, Kd), lambda i, j: (i, 0)),
            pl.BlockSpec((tn, Kd), lambda i, j: (j, 0)),
            pl.BlockSpec((tm, tn), lambda i, j: (i, j)),
        ],
        out_specs=pl.BlockSpec((tm, tn), lambda i, j: (i, j)),
        compiler_params=pltpu.CompilerParams(
            dimension_semantics=("parallel", "parallel"),
            vmem_limit_bytes=32 * 1024 * 1024,
        ),
        cost_estimate=cost,
    )(U, V, T)
    return out[:n_user, :n_item]


if __name__ == "__main__":
    # Deterministic parameter init (shapes implied by _MF: n_user x K, n_item x K)
    n_user, n_item, K, B = 64, 128, 32, 8
    key = jax.random.PRNGKey(0)
    ku, ki, kb, kr, kt = jax.random.split(key, 5)

    user_emb = jax.random.normal(ku, (n_user, K), dtype=jnp.float32) * 0.1
    item_emb = jax.random.normal(ki, (n_item, K), dtype=jnp.float32) * 0.1

    # A small training batch (user idx, item idx, rating)
    user_idx = jax.random.randint(kb, (B,), 0, n_user)
    item_idx = jax.random.randint(kr, (B,), 0, n_item)
    rating = jax.random.uniform(kt, (B,), minval=1.0, maxval=5.0, dtype=jnp.float32)

    # forward + SE loss (training hot path)
    se = jax.block_until_ready(
        mf_forward_se(user_emb, item_emb, user_idx, item_idx, rating)
    )

    # pred_all (full rating matrix)
    pred_mat = jax.block_until_ready(mf_pred_all(user_emb, item_emb))

    # fused maskedSE against a sparse "test" matrix
    test_mat = jnp.zeros((n_user, n_item), jnp.float32)
    test_mat = test_mat.at[user_idx, item_idx].set(rating)
    mse_mat = jax.block_until_ready(mf_masked_se(user_emb, item_emb, test_mat))

    # Reference check (plain JAX)
    ref_preds = jnp.sum(user_emb[user_idx] * item_emb[item_idx], axis=-1)
    ref_se = (ref_preds - rating) ** 2
    ref_pred_mat = user_emb @ item_emb.T
    ref_mse = jnp.where(test_mat != 0, (ref_pred_mat - test_mat) ** 2, 0.0)

    assert jnp.allclose(se, ref_se, atol=1e-5, rtol=1e-5)
    assert jnp.allclose(pred_mat, ref_pred_mat, atol=1e-5, rtol=1e-5)
    assert jnp.allclose(mse_mat, ref_mse, atol=1e-5, rtol=1e-5)

    print("KERNEL_OK")
</pallas_src>

<mosaic_0001>
module attributes {stable_mosaic.version = 11 : i64} {
  func.func @_pair_se_kernel(%arg0: i32, %arg1: memref<8x32xf32, #tpu.memory_space<vmem>>, %arg2: memref<8x32xf32, #tpu.memory_space<vmem>>, %arg3: memref<8x1xf32, #tpu.memory_space<vmem>>, %arg4: memref<8x1xf32, #tpu.memory_space<vmem>>) attributes {dimension_semantics = [#tpu.dimension_semantics<parallel>], iteration_bounds = array<i64: 1>, scalar_prefetch = 0 : i64, scratch_operands = 0 : i64, tpu.core_type = #tpu.core_type<tc>, window_params = [{transform_indices = @transform_0, window_bounds = array<i64: 8, 32>}, {transform_indices = @transform_1, window_bounds = array<i64: 8, 32>}, {transform_indices = @transform_2, window_bounds = array<i64: 8, 1>}, {transform_indices = @transform_3, window_bounds = array<i64: 8, 1>}]} {
    %c0 = arith.constant 0 : index
    %c0_0 = arith.constant 0 : index
    %0 = vector.load %arg1[%c0, %c0_0] : memref<8x32xf32, #tpu.memory_space<vmem>>, vector<8x32xf32>
    %c0_1 = arith.constant 0 : index
    %c0_2 = arith.constant 0 : index
    %1 = vector.load %arg2[%c0_1, %c0_2] : memref<8x32xf32, #tpu.memory_space<vmem>>, vector<8x32xf32>
    %2 = arith.mulf %0, %1 : vector<8x32xf32>
    %cst = arith.constant dense<0.000000e+00> : vector<8xf32>
    %3 = vector.multi_reduction <add>, %2, %cst [1] : vector<8x32xf32> to vector<8xf32>
    %4 = vector.shape_cast %3 : vector<8xf32> to vector<8x1xf32>
    %c0_3 = arith.constant 0 : index
    %c0_4 = arith.constant 0 : index
    %5 = vector.load %arg3[%c0_3, %c0_4] : memref<8x1xf32, #tpu.memory_space<vmem>>, vector<8x1xf32>
    %6 = arith.subf %4, %5 : vector<8x1xf32>
    %7 = arith.mulf %6, %6 : vector<8x1xf32>
    %c0_5 = arith.constant 0 : index
    %c0_6 = arith.constant 0 : index
    %8 = vector.load %arg4[%c0_5, %c0_6] : memref<8x1xf32, #tpu.memory_space<vmem>>, vector<8x1xf32>
    tpu.vector_store %arg4[%c0_5, %c0_6], %7 {strides = array<i32>} : memref<8x1xf32, #tpu.memory_space<vmem>>, vector<8x1xf32>,
    return
  }
  func.func @transform_0(%arg0: i32) -> (i32, i32) {
    %c0_i32 = arith.constant 0 : i32
    %c0_i32_0 = arith.constant 0 : i32
    return %arg0, %c0_i32 : i32, i32
  }
  func.func @transform_1(%arg0: i32) -> (i32, i32) {
    %c0_i32 = arith.constant 0 : i32
    %c0_i32_0 = arith.constant 0 : i32
    return %arg0, %c0_i32 : i32, i32
  }
  func.func @transform_2(%arg0: i32) -> (i32, i32) {
    %c0_i32 = arith.constant 0 : i32
    %c0_i32_0 = arith.constant 0 : i32
    return %arg0, %c0_i32 : i32, i32
  }
  func.func @transform_3(%arg0: i32) -> (i32, i32) {
    %c0_i32 = arith.constant 0 : i32
    %c0_i32_0 = arith.constant 0 : i32
    return %arg0, %c0_i32 : i32, i32
  }
}

</mosaic_0001>

<bundles_post_ra>
// kernel: tpu_custom_call.1
= control target key start
LH: loop header
LB: loop body
LE: loop exit
PB: predicated region body
PF: predicated region fallthrough
CT: control target
= control target key end

     0   :  { %8 = vsyncpa [#allocation3], 0  ;;  %s66_s12 = smov [#allocation2]   ;;  %s99_s0 = inlined_call_operand.vmem [shape: f32[8,32], index: 0, kind: input, shape index: {}]   ;;  %s100_s1 = inlined_call_operand.hbm [shape: f32[8,32], index: 1, kind: input, shape index: {}]   ;;  %s101_s2 = inlined_call_operand.vmem [shape: f32[8,1], index: 2, kind: input, shape index: {}]   ;;  %s102_s3 = inlined_call_operand.vmem [shape: f32[8,1], index: 3, kind: output, shape index: {}]  }
   0x1   :  { %s17_s13 = sshll.u32 %s66_s12, 4  ;;  %s18_s13 = int_to_ptr.vmem [resolvable:$true] %s17_s13 }
   0x2   :  { %s52_s14 = scalar_lea.vmem %s18_s13, 128  ;;  %p57_p1 = scmp.lt.s32.totalorder %s18_s13, %s18_s13 }
   0x3   :  { %p53_p0 = scmp.ne.s32.totalorder %s18_s13, %s52_s14  ;;  %p58_p2 = scmp.lt.s32.totalorder %s52_s14, %s52_s14 }
   0x5   :  { %p59_p3 = por %p58_p2, %p57_p1 }
   0x7   :  { %p60_p4 = pnand %p59_p3, %p53_p0 }
   0x9   :  { %63 = shalt.err (!%p60_p4)
}
   0xa   :  { %20 = dma.hbm_to_vmem [thread:$0]  %s100_s1, 128, %s18_s13, [#allocation3]  }
   0xb   :  { %64 = dma.done.wait [#allocation3], 128  }
   0xc   :  { %65 = vsyncadd [#allocation3], 4294967168  ;;  %v26_v0 = vld [vmem:[%s99_s0] sm:$0xff]  ;;  %vm29_vm0 = vcmask 261120   ;;  %vm36_vm1 = vcmask 7168  }
   0xd   :  { %v27_v1 = vld [vmem:[#allocation2] sm:$0xff] }
   0xe   :  { %v28_v2 = vmul.f32 %v27_v1, %v26_v0  ;;  %v33_v4 = vld [vmem:[%s101_s2] sm:$0xff] }
  0x10   :  { %v30_v3 = vsel %vm29_vm0, %v28_v2, 0.0 }
  0x11   :  { %31 = vadd.xlane.f32.xlu0 %v30_v3 }
  0x9a   :  { %v32_v5 = vpop.xlane.xlu0 %31 }
  0x9b   :  { %v34_v6 = vsub.f32 %v32_v5, %v33_v4 }
  0x9d   :  { %v35_v7 = vmul.f32 %v34_v6, %v34_v6 }
  0x9f   :  { %37 = vst.msk [vmem:[%s102_s3] sm:$0xff] %vm36_vm1, %v35_v7 }
  0xa0   :  { %42 = vsyncpa [#allocation3], 1 }

</bundles_post_ra>
